<compile_context>
chip_gen: v7x
topology: tpu7x:2x2x1
jax: 0.10.0
libtpu: 0.0.40
codegen_flags: <defaults>
</compile_context>

<pallas_src>
import math

import jax
import jax.numpy as jnp
from jax.experimental import pallas as pl
from jax.experimental.pallas import tpu as pltpu

_LANE = 128                       # lane granularity
_VMEM_BUDGET = 32 * 1024 * 1024   # bytes budgeted for blocks + scratch / step
_VMEM_LIMIT = 48 * 1024 * 1024    # scoped-VMEM limit handed to Mosaic


def _round_up(x, m):
    return -(-x // m) * m


def _plan(n_total, B, *, tn_cap=None, allow_split=True, split_threshold=8,
          vmem_budget=_VMEM_BUDGET):
    """Choose sublane fold k, padded sizes and lane tile for the slabs."""
    k = 8 // math.gcd(B, 8)           # fold factor so B*k is a multiple of 8
    rows = B * k
    # per grid step: 2 inputs x double buffer + f32 accumulator ~ 20*rows*tn B
    tn_limit = max(_LANE, (vmem_budget // (20 * rows)) // _LANE * _LANE)
    if tn_cap is not None:
        tn_limit = max(_LANE, min(tn_limit, (tn_cap // _LANE) * _LANE))

    quant = k * _LANE
    n_pad = _round_up(max(n_total, 1), quant)
    lanes = n_pad // k
    if lanes <= tn_limit:             # whole slab in one block -> fast path
        return dict(k=k, rows=rows, n_pad=n_pad, lanes=lanes, tn=lanes,
                    n_tiles=1, use_split=False)

    tn = tn_limit
    lanes = _round_up(lanes, tn)
    n_tiles = lanes // tn
    use_split = allow_split and n_tiles >= split_threshold
    if use_split and n_tiles % 2:
        lanes += tn
        n_tiles += 1
    n_pad = lanes * k
    return dict(k=k, rows=rows, n_pad=n_pad, lanes=lanes, tn=tn,
                n_tiles=n_tiles, use_split=use_split)


# ----------------------------- kernels --------------------------------------
def _wsum_single_kernel(sq_ref, w_ref, o_ref):
    """Single-shot: whole slab fits in one block; no scratch, no phases."""
    o_ref[...] = jnp.sum(sq_ref[...] * w_ref[...], axis=1, keepdims=True)


def _wsum_multi_kernel(sq_ref, w_ref, o_ref, acc_ref):
    """acc[r, n] += sq[r, n] * w[r, n]; one cross-lane reduce on the last step."""
    n = pl.program_id(0)

    @pl.when(n == 0)
    def _():
        acc_ref[...] = jnp.zeros_like(acc_ref)

    acc_ref[...] += sq_ref[...] * w_ref[...]

    @pl.when(n == pl.num_programs(0) - 1)
    def _():
        o_ref[...] = jnp.sum(acc_ref[...], axis=1, keepdims=True)


def _wsum_split_kernel(sq_ref, w_ref, o_ref, acc_ref):
    """Two-partial variant: leading 'parallel' axis, per-partial (1,rows,1) out."""
    n = pl.program_id(1)

    @pl.when(n == 0)
    def _():
        acc_ref[...] = jnp.zeros_like(acc_ref)

    acc_ref[...] += sq_ref[...] * w_ref[...]

    @pl.when(n == pl.num_programs(1) - 1)
    def _():
        o_ref[...] = jnp.sum(acc_ref[...], axis=1, keepdims=True)[None]


# ----------------------------- dispatcher ------------------------------------
def fused_weighted_sum(sq_list, w_list, *, tn_cap=None, allow_split=True,
                       split_threshold=8):
    """sum_n w[b,n] * sq[b,n] over all concatenated terms -> [B]."""
    B = sq_list[0].shape[0]
    sq_all = jnp.concatenate([s.astype(jnp.float32) for s in sq_list], axis=1)
    w_all = jnp.concatenate([w.astype(jnp.float32) for w in w_list], axis=1)
    n_total = sq_all.shape[1]

    p = _plan(n_total, B, tn_cap=tn_cap, allow_split=allow_split,
              split_threshold=split_threshold)
    k, rows, n_pad = p["k"], p["rows"], p["n_pad"]
    lanes, tn, n_tiles, use_split = p["lanes"], p["tn"], p["n_tiles"], p["use_split"]

    pad = n_pad - n_total
    if pad:
        # explicit zero pad of BOTH slabs (so pad lanes are exactly 0, never NaN)
        sq_all = jnp.pad(sq_all, ((0, 0), (0, pad)))
        w_all = jnp.pad(w_all, ((0, 0), (0, pad)))

    # contiguous (free) fold of the point axis into sublanes: (B, Npad)->(B*k, lanes)
    sq_slab = sq_all.reshape(rows, lanes)
    w_slab = w_all.reshape(rows, lanes)

    ce = pl.CostEstimate(flops=3 * rows * lanes, transcendentals=0,
                         bytes_accessed=2 * rows * lanes * 4 + rows * 4)

    if n_tiles == 1:
        out = pl.pallas_call(
            _wsum_single_kernel,
            out_shape=jax.ShapeDtypeStruct((rows, 1), jnp.float32),
            cost_estimate=ce,
            compiler_params=pltpu.CompilerParams(vmem_limit_bytes=_VMEM_LIMIT),
        )(sq_slab, w_slab)
        per_row = out[:, 0]
    elif not use_split:
        out = pl.pallas_call(
            _wsum_multi_kernel,
            out_shape=jax.ShapeDtypeStruct((rows, 1), jnp.float32),
            grid_spec=pltpu.PrefetchScalarGridSpec(
                num_scalar_prefetch=0,
                grid=(n_tiles,),
                in_specs=[pl.BlockSpec((rows, tn), lambda n: (0, n)),
                          pl.BlockSpec((rows, tn), lambda n: (0, n))],
                out_specs=pl.BlockSpec((rows, 1), lambda n: (0, 0)),
                scratch_shapes=[pltpu.VMEM((rows, tn), jnp.float32)]),
            compiler_params=pltpu.CompilerParams(
                dimension_semantics=("arbitrary",),
                vmem_limit_bytes=_VMEM_LIMIT),
            cost_estimate=ce,
        )(sq_slab, w_slab)
        per_row = out[:, 0]
    else:
        half = n_tiles // 2
        out = pl.pallas_call(
            _wsum_split_kernel,
            out_shape=jax.ShapeDtypeStruct((2, rows, 1), jnp.float32),
            grid_spec=pltpu.PrefetchScalarGridSpec(
                num_scalar_prefetch=0,
                grid=(2, half),
                in_specs=[
                    pl.BlockSpec((rows, tn), lambda c, n: (0, c * half + n)),
                    pl.BlockSpec((rows, tn), lambda c, n: (0, c * half + n)),
                ],
                out_specs=pl.BlockSpec((1, rows, 1), lambda c, n: (c, 0, 0)),
                scratch_shapes=[pltpu.VMEM((rows, tn), jnp.float32)]),
            compiler_params=pltpu.CompilerParams(
                dimension_semantics=("parallel", "arbitrary"),
                vmem_limit_bytes=_VMEM_LIMIT),
            cost_estimate=ce,
        )(sq_slab, w_slab)
        per_row = out.sum(axis=0)[:, 0]

    # fold the k sublane chunks back to per-batch sums (tiny XLA op)
    return per_row.reshape(B, k).sum(axis=1)


# ----------------------------- PWCLoss forward --------------------------------
def index_points(points, idx):
    """points: [B, N, C], idx: [B, S] -> [B, S, C] (PointNet++ index_points)."""
    B, S = idx.shape
    C = points.shape[-1]
    idx_b = jnp.broadcast_to(idx[:, :, None], (B, S, C))
    return jnp.take_along_axis(points, idx_b, axis=1)


def pwc_loss_disp_l2(flowed_points, flowed_weights, gt_points,
                     floweds, fps_idxs, control_shift=None,
                     multi_scale_weight=(0.02, 0.04, 0.08, 0.16),
                     **fused_kwargs):
    """Forward of PWCLoss with loss_type='disp_l2', loss_order=2, has_gt=True."""
    num_scale = len(floweds)
    offset = len(fps_idxs) - num_scale + 1
    B = flowed_points.shape[0]

    gt = [gt_points]
    w = [flowed_weights]
    for fps_idx in fps_idxs:
        sub_gt = index_points(gt[-1], fps_idx)
        sub_w = index_points(w[-1], fps_idx)
        gt.append(sub_gt)
        w.append(sub_w / jnp.sum(sub_w, axis=1, keepdims=True))

    sq_list = []
    w_list = []
    # per-scale terms: ||f-g||^2 computed in XLA (fuses), alpha folded into w
    for i in range(num_scale):
        d = (floweds[i] - gt[i + offset]).astype(jnp.float32)
        sq_list.append(jnp.sum(d * d, axis=2))
        w_list.append(multi_scale_weight[i] * w[i + offset][..., 0])

    # full-resolution term: fold the 1/sum(w) normalization into the weights
    d = (flowed_points - gt_points).astype(jnp.float32)
    sq_list.append(jnp.sum(d * d, axis=2))
    w_norm = flowed_weights / jnp.sum(flowed_weights, axis=1, keepdims=True)
    w_list.append(w_norm[..., 0])

    # control-shift regularizer: g = 0, weight = 10 / M
    if control_shift is not None:
        M = control_shift.shape[1]
        cs = control_shift.astype(jnp.float32)
        sq_list.append(jnp.sum(cs * cs, axis=2))
        w_list.append(jnp.full((B, M), 10.0 / M, jnp.float32))

    return fused_weighted_sum(sq_list, w_list, **fused_kwargs)


# ------------------------- pure-JAX reference ---------------------------------
def _ref_loss(flowed_points, flowed_weights, gt_points, floweds, fps_idxs,
              control_shift, alpha=(0.02, 0.04, 0.08, 0.16)):
    num_scale = len(floweds)
    offset = len(fps_idxs) - num_scale + 1
    gt = [gt_points]
    w = [flowed_weights]
    for fps_idx in fps_idxs:
        gt.append(index_points(gt[-1], fps_idx))
        sub_w = index_points(w[-1], fps_idx)
        w.append(sub_w / jnp.sum(sub_w, axis=1, keepdims=True))
    total = 0.0
    for i in range(num_scale):
        diff = floweds[i] - gt[i + offset]
        total = total + alpha[i] * jnp.sum(
            jnp.sum(diff ** 2, axis=2, keepdims=True) * w[i + offset], axis=1)
    w_norm = flowed_weights / jnp.sum(flowed_weights, axis=1, keepdims=True)
    add = jnp.sum(jnp.sum((flowed_points - gt_points) ** 2, axis=2,
                          keepdims=True) * w_norm, axis=1)
    reg = jnp.mean(jnp.sum(control_shift ** 2, axis=2), axis=1) * 10.0
    return total[..., 0] + add[..., 0] + reg


if __name__ == "__main__":
    key = jax.random.PRNGKey(0)
    B, N, C, M = 2, 256, 3, 32
    scales = [N, N // 2, N // 4]           # 256, 128, 64

    keys = jax.random.split(key, 12)
    flowed_points = jax.random.normal(keys[0], (B, N, C), jnp.float32)
    gt_points = jax.random.normal(keys[1], (B, N, C), jnp.float32)
    flowed_weights = jax.random.uniform(keys[2], (B, N, 1), jnp.float32) + 0.1

    # deterministic FPS-like index sets (random permutations, no replacement)
    fps_idxs = []
    prev = N
    for si, s in enumerate(scales[1:]):
        perm = jnp.stack([
            jax.random.permutation(jax.random.fold_in(keys[3], b * 10 + si),
                                   prev)[:s]
            for b in range(B)
        ])
        fps_idxs.append(perm.astype(jnp.int32))
        prev = s

    floweds = [
        jax.random.normal(keys[4 + i], (B, s, C), jnp.float32)
        for i, s in enumerate(scales)
    ]
    control_shift = 0.1 * jax.random.normal(keys[8], (B, M, C), jnp.float32)

    ref = _ref_loss(flowed_points, flowed_weights, gt_points,
                    floweds, fps_idxs, control_shift)

    # 1) default: single-shot fast path (whole slab in one block)
    loss = jax.block_until_ready(
        pwc_loss_disp_l2(flowed_points, flowed_weights, gt_points,
                         floweds, fps_idxs, control_shift))
    assert loss.shape == (B,)
    assert jnp.allclose(loss, ref, rtol=1e-5, atol=1e-5), (loss, ref)

    # 2) forced multi-step accumulate path (small lane tile, 'arbitrary' axis)
    loss2 = jax.block_until_ready(
        pwc_loss_disp_l2(flowed_points, flowed_weights, gt_points,
                         floweds, fps_idxs, control_shift,
                         tn_cap=128, allow_split=False))
    assert jnp.allclose(loss2, ref, rtol=1e-5, atol=1e-5), (loss2, ref)

    # 3) forced two-partial 'parallel' split path (v7x-style, correctness check)
    loss3 = jax.block_until_ready(
        pwc_loss_disp_l2(flowed_points, flowed_weights, gt_points,
                         floweds, fps_idxs, control_shift,
                         tn_cap=128, split_threshold=2))
    assert jnp.allclose(loss3, ref, rtol=1e-5, atol=1e-5), (loss3, ref)

    print("KERNEL_OK")
</pallas_src>

<mosaic_0001>
module attributes {stable_mosaic.version = 11 : i64} {
  func.func @_wsum_single_kernel(%arg0: memref<8x256xf32, #tpu.memory_space<vmem>>, %arg1: memref<8x256xf32, #tpu.memory_space<vmem>>, %arg2: memref<8x1xf32, #tpu.memory_space<vmem>>) attributes {dimension_semantics = [], scalar_prefetch = 0 : i64, scratch_operands = 0 : i64, tpu.core_type = #tpu.core_type<tc>} {
    %c0 = arith.constant 0 : index
    %c0_0 = arith.constant 0 : index
    %0 = vector.load %arg0[%c0, %c0_0] : memref<8x256xf32, #tpu.memory_space<vmem>>, vector<8x256xf32>
    %c0_1 = arith.constant 0 : index
    %c0_2 = arith.constant 0 : index
    %1 = vector.load %arg1[%c0_1, %c0_2] : memref<8x256xf32, #tpu.memory_space<vmem>>, vector<8x256xf32>
    %2 = arith.mulf %0, %1 : vector<8x256xf32>
    %cst = arith.constant dense<0.000000e+00> : vector<8xf32>
    %3 = vector.multi_reduction <add>, %2, %cst [1] : vector<8x256xf32> to vector<8xf32>
    %4 = vector.shape_cast %3 : vector<8xf32> to vector<8x1xf32>
    %c0_3 = arith.constant 0 : index
    %c0_4 = arith.constant 0 : index
    %5 = vector.load %arg2[%c0_3, %c0_4] : memref<8x1xf32, #tpu.memory_space<vmem>>, vector<8x1xf32>
    tpu.vector_store %arg2[%c0_3, %c0_4], %4 {strides = array<i32>} : memref<8x1xf32, #tpu.memory_space<vmem>>, vector<8x1xf32>,
    return
  }
}

</mosaic_0001>

<bundles_post_ra>
// kernel: tpu_custom_call.1
= control target key start
LH: loop header
LB: loop body
LE: loop exit
PB: predicated region body
PF: predicated region fallthrough
CT: control target
= control target key end

     0   :  { %7 = vsyncpa [#allocation3], 0  ;;  %s146_s0 = inlined_call_operand.hbm [shape: f32[8,256], index: 0, kind: input, shape index: {}]   ;;  %s147_s1 = inlined_call_operand.hbm [shape: f32[8,256], index: 1, kind: input, shape index: {}]   ;;  %s148_s2 = inlined_call_operand.vmem [shape: f32[8,1], index: 2, kind: output, shape index: {}]  }
   0x1   :  { %8 = vsyncpa [#allocation5], 0  ;;  %s102_s9 = smov [#allocation2]   ;;  %s103_s11 = smov [#allocation4]  }
   0x2   :  { %s15_s10 = sshll.u32 %s102_s9, 4  ;;  %s25_s12 = sshll.u32 %s103_s11, 4  ;;  %s16_s10 = int_to_ptr.vmem [resolvable:$true] %s15_s10  ;;  %s26_s12 = int_to_ptr.vmem [resolvable:$true] %s25_s12 }
   0x3   :  { %s54_s15 = scalar_lea.hbm %s146_s0, 256 }
   0x4   :  { %p55_p0 = scmp.ne.s32.totalorder %s146_s0, %s54_s15  ;;  %p58_p1 = scmp.lt.u32.totalorder %s54_s15, %s146_s0 }
   0x6   :  { %p60_p2 = pnand %p58_p1, %p55_p0 }
   0x8   :  { %63 = shalt.err (!%p60_p2)
}
   0x9   :  { %s64_s20 = scalar_lea.vmem %s16_s10, 256  ;;  %p69_p4 = scmp.lt.s32.totalorder %s16_s10, %s16_s10 }
   0xa   :  { %p65_p3 = scmp.ne.s32.totalorder %s16_s10, %s64_s20  ;;  %p70_p5 = scmp.lt.s32.totalorder %s64_s20, %s64_s20 }
   0xc   :  { %p71_p6 = por %p70_p5, %p69_p4 }
   0xe   :  { %p72_p7 = pnand %p71_p6, %p65_p3 }
  0x10   :  { %75 = shalt.err (!%p72_p7)
}
  0x11   :  { %18 = dma.hbm_to_vmem [thread:$0]  %s146_s0, 256, %s16_s10, [#allocation3]  }
  0x12   :  { %s76_s25 = scalar_lea.hbm %s147_s1, 256 }
  0x13   :  { %p77_p8 = scmp.ne.s32.totalorder %s147_s1, %s76_s25  ;;  %p80_p9 = scmp.lt.u32.totalorder %s76_s25, %s147_s1 }
  0x15   :  { %p82_p10 = pnand %p80_p9, %p77_p8 }
  0x17   :  { %85 = shalt.err (!%p82_p10)
}
  0x18   :  { %s86_s30 = scalar_lea.vmem %s26_s12, 256  ;;  %p91_p12 = scmp.lt.s32.totalorder %s26_s12, %s26_s12 }
  0x19   :  { %p87_p11 = scmp.ne.s32.totalorder %s26_s12, %s86_s30  ;;  %p92_p13 = scmp.lt.s32.totalorder %s86_s30, %s86_s30 }
  0x1b   :  { %p93_p0 = por %p92_p13, %p91_p12 }
  0x1d   :  { %p94_p1 = pnand %p93_p0, %p87_p11 }
  0x1f   :  { %97 = shalt.err (!%p94_p1)
}
  0x20   :  { %28 = dma.hbm_to_vmem [thread:$0]  %s147_s1, 256, %s26_s12, [#allocation5]  }
  0x21   :  { %98 = dma.done.wait [#allocation3], 256  }
  0x22   :  { %99 = vsyncadd [#allocation3], 4294967040 }
  0x23   :  { %100 = dma.done.wait [#allocation5], 256  }
  0x24   :  { %101 = vsyncadd [#allocation5], 4294967040  ;;  %v35_v0 = vld [vmem:[#allocation2] sm:$0xff]  ;;  %v36_v1 = vld [vmem:[#allocation2 + $0x8] sm:$0xff]  ;;  %vm44_vm0 = vcmask 7168  }
  0x25   :  { %v37_v2 = vld [vmem:[#allocation4] sm:$0xff]  ;;  %v38_v3 = vld [vmem:[#allocation4 + $0x8] sm:$0xff] }
  0x26   :  { %v39_v4 = vmul.f32 %v37_v2, %v35_v0  ;;  %v40_v5 = vmul.f32 %v38_v3, %v36_v1 }
  0x28   :  { %v41_v6 = vadd.f32 %v40_v5, %v39_v4 }
  0x2a   :  { %42 = vadd.xlane.f32.xlu0 %v41_v6 }
  0xb7   :  { %v43_v7 = vpop.xlane.xlu0 %42 }
  0xb8   :  { %45 = vst.msk [vmem:[%s148_s2] sm:$0xff] %vm44_vm0, %v43_v7 }
  0xb9   :  { %50 = vsyncpa [#allocation3], 1 }
  0xba   :  { %51 = vsyncpa [#allocation5], 1 }

</bundles_post_ra>
